<compile_context>
chip_gen: v7x
topology: tpu7x:2x2x1
jax: 0.10.0
libtpu: 0.0.40
codegen_flags: <defaults>
</compile_context>

<pallas_src>
import functools

import jax
import jax.numpy as jnp
from jax import lax
from jax.experimental import pallas as pl
from jax.experimental.pallas import tpu as pltpu


_TM_GRANULE = 256    # MXU / bf16-sublane friendly M-tile granule (multiple of 128)
_TM_MAX = 4096       # upper cap on the M tile


def _mm_bias_kernel(a_ref, b_ref, bias_ref, o_ref):
    """o = a @ b + bias with f32 MXU accumulation, stored in o_ref.dtype.

    Two layouts share this body:
      * MK path: a = (tm, K) patch tile, b = (K, E) weight, bias = (1, E) -> o = (tm, E)
      * KM path: a = (E, K) weight, b = (K, tm) patch tile, bias = (E, 1) -> o = (E, tm)
    The KM path keeps the output lane dim = tm (multiple of 128), so stores are
    unmasked even when embed_dim < 128.
    """
    acc = jnp.dot(a_ref[...], b_ref[...], preferred_element_type=jnp.float32)
    o_ref[...] = (acc + bias_ref[...]).astype(o_ref.dtype)


def _vmem_capacity_bytes():
    try:
        return int(pltpu.get_tpu_info().vmem_capacity_bytes)
    except Exception:
        return 64 * 1024 * 1024   # conservative fallback: v7x per-TensorCore VMEM


def _plan(M, K, N, in_bytes, out_bytes):
    """Pick (tm, vmem_limit_bytes), generation-aware.

    vmem_limit = half of physical VMEM capped at 64 MiB (-> 64 MiB on v5e/v6e,
    32 MiB on v7x).  The M-tile budget subtracts the resident (double-buffered)
    weight/bias and leaves slack for internal scratch; per-row cost counts the
    double-buffered input/output tiles plus the f32 accumulator.
    """
    cap = _vmem_capacity_bytes()
    vmem_limit = int(min(cap // 2, 64 * 1024 * 1024))

    resident = 2 * (K * N * in_bytes + N * 4)               # weight + bias, 2 buffers
    tile_budget = max(vmem_limit - resident - (4 << 20), 2 << 20)
    per_row = 2 * K * in_bytes + 2 * N * out_bytes + N * 4  # in/out tiles (x2) + f32 acc

    if M <= _TM_GRANULE:
        return int(M), vmem_limit

    tm = tile_budget // per_row
    tm = min(tm, _TM_MAX)
    # Prefer >= 2 grid steps whenever M allows it (v7x has 2 TensorCores/chip).
    half = -(-M // 2)
    half = -(-half // _TM_GRANULE) * _TM_GRANULE
    tm = min(tm, half)
    tm = max(_TM_GRANULE, (tm // _TM_GRANULE) * _TM_GRANULE)
    return int(tm), vmem_limit


@functools.partial(jax.jit, static_argnames=("tm", "out_dtype", "vmem_limit"))
def _proj_mk(patches, w_kn, bias_1n, *, tm, out_dtype, vmem_limit):
    """patches (M, K) @ w (K, N) + bias (1, N) -> (M, N).  Used when N >= 128."""
    M, K = patches.shape
    _, N = w_kn.shape
    return pl.pallas_call(
        _mm_bias_kernel,
        out_shape=jax.ShapeDtypeStruct((M, N), out_dtype),
        grid_spec=pltpu.PrefetchScalarGridSpec(
            num_scalar_prefetch=0,
            grid=(pl.cdiv(M, tm),),
            in_specs=[
                pl.BlockSpec((tm, K), lambda i: (i, 0)),   # streamed M tiles (contiguous)
                pl.BlockSpec((K, N), lambda i: (0, 0)),    # weight resident
                pl.BlockSpec((1, N), lambda i: (0, 0)),    # bias resident
            ],
            out_specs=pl.BlockSpec((tm, N), lambda i: (i, 0)),
        ),
        compiler_params=pltpu.CompilerParams(
            dimension_semantics=("parallel",),
            vmem_limit_bytes=vmem_limit,
        ),
    )(patches, w_kn, bias_1n)


@functools.partial(jax.jit, static_argnames=("tm", "out_dtype", "vmem_limit"))
def _proj_km(patches_t, w_nk, bias_n1, *, tm, out_dtype, vmem_limit):
    """w (N, K) @ patches^T (K, M) + bias (N, 1) -> (N, M).  Lane-dense output
    even for N < 128 (the streamed M tile sits on the lane axis)."""
    K, M = patches_t.shape
    N, _ = w_nk.shape
    return pl.pallas_call(
        _mm_bias_kernel,
        out_shape=jax.ShapeDtypeStruct((N, M), out_dtype),
        grid_spec=pltpu.PrefetchScalarGridSpec(
            num_scalar_prefetch=0,
            grid=(pl.cdiv(M, tm),),
            in_specs=[
                pl.BlockSpec((N, K), lambda i: (0, 0)),    # weight resident
                pl.BlockSpec((K, tm), lambda i: (0, i)),   # streamed M tiles
                pl.BlockSpec((N, 1), lambda i: (0, 0)),    # bias resident
            ],
            out_specs=pl.BlockSpec((N, tm), lambda i: (0, i)),
        ),
        compiler_params=pltpu.CompilerParams(
            dimension_semantics=("parallel",),
            vmem_limit_bytes=vmem_limit,
        ),
    )(w_nk, patches_t, bias_n1)


class PatchEmbed:
    """JAX/Pallas equivalent of the PyTorch PatchEmbed (norm_layer=None -> Identity)."""

    def __init__(
        self,
        img_size=16,
        patch_size=8,
        num_frames=2,
        tubelet_size=1,
        in_chans=4,
        embed_dim=32,
        norm_layer=None,
        flatten=True,
        bias=True,
        compute_dtype=jnp.bfloat16,   # MXU operand dtype; set to f32 if accuracy matters
        out_dtype=None,               # defaults to compute_dtype (bf16 downstream encoder)
        key=None,
    ):
        img_size = (img_size, img_size) if isinstance(img_size, int) else tuple(img_size)
        patch_size = (patch_size, patch_size) if isinstance(patch_size, int) else tuple(patch_size)
        self.img_size = img_size
        self.patch_size = patch_size
        self.num_frames = num_frames
        self.tubelet_size = tubelet_size
        self.grid_size = (
            num_frames // tubelet_size,
            img_size[0] // patch_size[0],
            img_size[1] // patch_size[1],
        )
        self.num_patches = self.grid_size[0] * self.grid_size[1] * self.grid_size[2]
        self.flatten = flatten
        self.in_chans = in_chans
        self.embed_dim = embed_dim
        self.compute_dtype = compute_dtype
        self.out_dtype = compute_dtype if out_dtype is None else out_dtype
        # TODO(synk): norm_layer is None in this config -> Identity; no kernel needed.
        assert norm_layer is None, "only norm_layer=None (Identity) is implemented"

        # Conv3d parameters: weight (E, C, t, ph, pw), bias (E,). Deterministic init.
        key = jax.random.PRNGKey(0) if key is None else key
        wkey, bkey = jax.random.split(key)
        wshape = (embed_dim, in_chans, tubelet_size, patch_size[0], patch_size[1])
        fan_in = in_chans * tubelet_size * patch_size[0] * patch_size[1]
        scale = 1.0 / float(fan_in) ** 0.5
        self.weight = jax.random.uniform(wkey, wshape, jnp.float32, -scale, scale)
        self.bias = (
            jax.random.uniform(bkey, (embed_dim,), jnp.float32, -scale, scale)
            if bias
            else jnp.zeros((embed_dim,), jnp.float32)
        )

        # Precompute matmul-form weight/bias once, in the layout the kernel wants.
        K = fan_in
        self._lane_dense_out = embed_dim < 128
        if self._lane_dense_out:
            # KM path: (E, K) weight, (E, 1) bias; kernel output (E, M) is lane-dense.
            self.w_mat = self.weight.reshape(embed_dim, K).astype(compute_dtype)
            self.bias_mat = self.bias.reshape(embed_dim, 1)
        else:
            # MK path: (K, E) weight, (1, E) bias; (tm, E) output already lane-dense.
            self.w_mat = self.weight.reshape(embed_dim, K).T.astype(compute_dtype)
            self.bias_mat = self.bias.reshape(1, embed_dim)

    def __call__(self, x):
        # x: (B, C, T, H, W), same layout as PyTorch.
        B, C, T, H, W = x.shape
        ts = self.tubelet_size
        ph, pw = self.patch_size
        gt, gh, gw = T // ts, H // ph, W // pw
        E = self.embed_dim
        K = C * ts * ph * pw
        P = gt * gh * gw
        M = B * P

        # Patch order (B, T', H', W'); within-patch order (C, t, h, w) to match
        # the Conv3d weight layout.  XLA materializes this once as a contiguous
        # matrix so the kernel streams large DMAs (no fused tiny strided reads).
        xp = x.reshape(B, C, gt, ts, gh, ph, gw, pw)

        if M < 8:
            # TODO(synk): degenerate-M fallback; pallas_call/DMA fixed overhead
            # dominates a sub-sublane matmul, so just let XLA do it.
            patches = jnp.transpose(xp, (0, 2, 4, 6, 1, 3, 5, 7)).reshape(M, K)
            out = (patches.astype(jnp.float32) @ self.weight.reshape(E, K).T
                   + self.bias).astype(self.out_dtype)
        else:
            in_bytes = jnp.dtype(self.compute_dtype).itemsize
            out_bytes = jnp.dtype(self.out_dtype).itemsize
            tm, vmem_limit = _plan(M, K, E, in_bytes, out_bytes)
            if self._lane_dense_out:
                patches_t = (
                    jnp.transpose(xp, (1, 3, 5, 7, 0, 2, 4, 6))
                    .reshape(K, M)
                    .astype(self.compute_dtype)
                )
                out_t = _proj_km(patches_t, self.w_mat, self.bias_mat,
                                 tm=tm, out_dtype=self.out_dtype,
                                 vmem_limit=vmem_limit)          # (E, M)
                out = out_t.T                                     # small vs. input traffic
            else:
                patches = (
                    jnp.transpose(xp, (0, 2, 4, 6, 1, 3, 5, 7))
                    .reshape(M, K)
                    .astype(self.compute_dtype)
                )
                out = _proj_mk(patches, self.w_mat, self.bias_mat,
                               tm=tm, out_dtype=self.out_dtype,
                               vmem_limit=vmem_limit)             # (M, E)

        out = out.reshape(B, P, E)
        if not self.flatten:
            out = jnp.transpose(out.reshape(B, gt, gh, gw, E), (0, 4, 1, 2, 3))
        return out


if __name__ == "__main__":
    # Small deterministic example consistent with the module's forward:
    # B=2, C=4 (in_chans), T=2 frames, H=W=16, patch=8, tubelet=1, embed_dim=32.
    key = jax.random.PRNGKey(0)
    xkey, pkey = jax.random.split(key)
    B, C, T, H, W = 2, 4, 2, 16, 16
    x = jax.random.normal(xkey, (B, C, T, H, W), jnp.float32)

    pe = PatchEmbed(
        img_size=16,
        patch_size=8,
        num_frames=2,
        tubelet_size=1,
        in_chans=4,
        embed_dim=32,
        key=pkey,
    )

    out = jax.block_until_ready(pe(x))
    assert out.shape == (B, pe.num_patches, pe.embed_dim), out.shape
    assert out.dtype == jnp.dtype(pe.out_dtype), out.dtype

    # Reference: lax Conv3d with stride == kernel.  Inputs pre-rounded to bf16
    # so the reference matches the kernel's bf16-operand / f32-accumulation
    # numerics and the tolerance can stay tight.
    xq = x.astype(jnp.bfloat16).astype(jnp.float32)
    wq = pe.weight.astype(jnp.bfloat16).astype(jnp.float32)
    ref = lax.conv_general_dilated(
        xq,
        wq,
        window_strides=(pe.tubelet_size, pe.patch_size[0], pe.patch_size[1]),
        padding="VALID",
        dimension_numbers=("NCDHW", "OIDHW", "NCDHW"),
    ) + pe.bias.reshape(1, -1, 1, 1, 1)
    ref = ref.reshape(B, pe.embed_dim, -1).transpose(0, 2, 1)

    out_f32 = out.astype(jnp.float32)
    err = float(jnp.max(jnp.abs(out_f32 - ref)))
    assert jnp.allclose(out_f32, ref, atol=2e-2, rtol=2e-2), err

    print("KERNEL_OK")
</pallas_src>

<mosaic_0001>
module attributes {stable_mosaic.version = 11 : i64} {
  func.func @_mm_bias_kernel(%arg0: i32, %arg1: memref<32x256xbf16, #tpu.memory_space<vmem>>, %arg2: memref<256x16xbf16, #tpu.memory_space<vmem>>, %arg3: memref<32x1xf32, #tpu.memory_space<vmem>>, %arg4: memref<32x16xbf16, #tpu.memory_space<vmem>>) attributes {dimension_semantics = [#tpu.dimension_semantics<parallel>], iteration_bounds = array<i64: 1>, scalar_prefetch = 0 : i64, scratch_operands = 0 : i64, tpu.core_type = #tpu.core_type<tc>, window_params = [{pipeline_mode = #tpu.pipeline_mode<synchronous>, transform_indices = @transform_0, window_bounds = array<i64: 32, 256>}, {transform_indices = @transform_1, window_bounds = array<i64: 256, 16>}, {pipeline_mode = #tpu.pipeline_mode<synchronous>, transform_indices = @transform_2, window_bounds = array<i64: 32, 1>}, {transform_indices = @transform_3, window_bounds = array<i64: 32, 16>}]} {
    %c0 = arith.constant 0 : index
    %c0_0 = arith.constant 0 : index
    %0 = vector.load %arg1[%c0, %c0_0] : memref<32x256xbf16, #tpu.memory_space<vmem>>, vector<32x256xbf16>
    %c0_1 = arith.constant 0 : index
    %c0_2 = arith.constant 0 : index
    %1 = vector.load %arg2[%c0_1, %c0_2] : memref<256x16xbf16, #tpu.memory_space<vmem>>, vector<256x16xbf16>
    %cst = arith.constant dense<0.000000e+00> : vector<32x16xf32>
    %2 = tpu.matmul %0, %1, %cst {dimension_numbers = #tpu.dot_dimension_numbers<[1], [0], [0], [1], [0, 0, 1, 1], [], []>} : vector<32x256xbf16>, vector<256x16xbf16>, vector<32x16xf32> -> vector<32x16xf32>
    %c0_3 = arith.constant 0 : index
    %c0_4 = arith.constant 0 : index
    %3 = vector.load %arg3[%c0_3, %c0_4] : memref<32x1xf32, #tpu.memory_space<vmem>>, vector<32x1xf32>
    %4 = vector.broadcast %3 : vector<32x1xf32> to vector<32x16xf32>
    %5 = arith.addf %2, %4 : vector<32x16xf32>
    %6 = arith.truncf %5 : vector<32x16xf32> to vector<32x16xbf16>
    %c0_5 = arith.constant 0 : index
    %c0_6 = arith.constant 0 : index
    %7 = vector.load %arg4[%c0_5, %c0_6] : memref<32x16xbf16, #tpu.memory_space<vmem>>, vector<32x16xbf16>
    tpu.vector_store %arg4[%c0_5, %c0_6], %6 {strides = array<i32>} : memref<32x16xbf16, #tpu.memory_space<vmem>>, vector<32x16xbf16>,
    return
  }
  func.func @transform_0(%arg0: i32) -> (i32, i32) {
    %c0_i32 = arith.constant 0 : i32
    %c0_i32_0 = arith.constant 0 : i32
    %c0_i32_1 = arith.constant 0 : i32
    return %c0_i32, %c0_i32_0 : i32, i32
  }
  func.func @transform_1(%arg0: i32) -> (i32, i32) {
    %c0_i32 = arith.constant 0 : i32
    %c0_i32_0 = arith.constant 0 : i32
    return %c0_i32, %arg0 : i32, i32
  }
  func.func @transform_2(%arg0: i32) -> (i32, i32) {
    %c0_i32 = arith.constant 0 : i32
    %c0_i32_0 = arith.constant 0 : i32
    %c0_i32_1 = arith.constant 0 : i32
    return %c0_i32, %c0_i32_0 : i32, i32
  }
  func.func @transform_3(%arg0: i32) -> (i32, i32) {
    %c0_i32 = arith.constant 0 : i32
    %c0_i32_0 = arith.constant 0 : i32
    return %c0_i32, %arg0 : i32, i32
  }
}

</mosaic_0001>

<bundles_post_ra>
// kernel: _proj_km.1
= control target key start
LH: loop header
LB: loop body
LE: loop exit
PB: predicated region body
PF: predicated region fallthrough
CT: control target
= control target key end

     0   :  { %v362_v1 = vmov 0   ;;  %vm256_vm0 = vcmask 125952   ;;  %s467_s1 = inlined_call_operand.vmem [shape: bf16[256,16], index: 1, kind: input, shape index: {}]   ;;  %s468_s0 = inlined_call_operand.vmem [shape: bf16[32,256], index: 0, kind: input, shape index: {}]   ;;  %s469_s2 = inlined_call_operand.vmem [shape: f32[32,1], index: 2, kind: input, shape index: {}]   ;;  %s470_s3 = inlined_call_operand.vmem [shape: bf16[32,16], index: 3, kind: output, shape index: {}]  }
   0x1   :  { %v340_v0 = vld [vmem:[%s467_s1 + $0x40] sm:$0xff]   ;;  %339 = vset.pattern.permute.xlu1 %v362_v1  ;;  %338 = vset.pattern.permute.xlu0 %v362_v1  ;;  %v342_v3 = vld [vmem:[%s467_s1 + $0x48] sm:$0xff]   ;;  %v344_v5 = vld [vmem:[%s467_s1 + $0x50] sm:$0xff]  }
   0x2   :  { %v341_v2 = vld [vmem:[%s467_s1] sm:$0xff]   ;;  %293 = vmatprep.subr.bf16.mxu0 %v340_v0  ;;  %321 = vmatprep.subr.bf16.mxu1 %v340_v0  ;;  %v343_v4 = vld [vmem:[%s467_s1 + $0x8] sm:$0xff]   ;;  %v345_v6 = vld [vmem:[%s467_s1 + $0x10] sm:$0xff]  }
   0x3   :  { %294 = vmatpush3.bf16.msra.mxu0 %v341_v2  ;;  %329 = vmatpush3.bf16.msra.mxu1 %v341_v2  ;;  %v346_v7 = vld [vmem:[%s467_s1 + $0x58] sm:$0xff]   ;;  %v348_v9 = vld [vmem:[%s467_s1 + $0x60] sm:$0xff]   ;;  %v350_v11 = vld [vmem:[%s467_s1 + $0x68] sm:$0xff]  }
   0x4   :  { %295 = vmatprep.subr.bf16.mxu0 %v342_v3  ;;  %322 = vmatprep.subr.bf16.mxu1 %v342_v3  ;;  %v347_v8 = vld [vmem:[%s467_s1 + $0x18] sm:$0xff]   ;;  %v349_v10 = vld [vmem:[%s467_s1 + $0x20] sm:$0xff]   ;;  %v351_v14 = vld [vmem:[%s467_s1 + $0x28] sm:$0xff]  }
   0x5   :  { %v358_v12 = vld [vmem:[%s468_s0 + $0x4] ss:$8 sps:$4 sm:$0xff]   ;;  %v361_v13 = vld [vmem:[%s468_s0 + $0x14] ss:$8 sps:$4 sm:$0xff]   ;;  %v356_v23 = vld [vmem:[%s468_s0] ss:$8 sps:$4 sm:$0xff]  }
   0x6   :  { %v53_v15 = vld [vmem:[%s469_s2 + $0x10] sm:$0xff]  ;;  %v51_v16 = vld [vmem:[%s469_s2] sm:$0xff]  ;;  %223 = vmatprep.mubr.bf16.mxu0 %v358_v12  ;;  %231 = vmatprep.mubr.bf16.mxu1 %v361_v13  ;;  %v54_v19 = vld [vmem:[%s469_s2 + $0x18] sm:$0xff] }
   0x7   :  { %296 = vmatpush3.bf16.msra.mxu0 %v343_v4  ;;  %330 = vmatpush3.bf16.msra.mxu1 %v343_v4  ;;  %v352_v17 = vld [vmem:[%s467_s1 + $0x70] sm:$0xff]   ;;  %v52_v20 = vld [vmem:[%s469_s2 + $0x8] sm:$0xff]  ;;  %v354_v21 = vld [vmem:[%s467_s1 + $0x78] sm:$0xff]  }
   0x8   :  { %297 = vmatprep.subr.bf16.mxu0 %v344_v5  ;;  %323 = vmatprep.subr.bf16.mxu1 %v344_v5  ;;  %v353_v18 = vld [vmem:[%s467_s1 + $0x30] sm:$0xff]   ;;  %v355_v22 = vld [vmem:[%s467_s1 + $0x38] sm:$0xff]  }
   0x9   :  { %67 = vperm.xlu1 %339, %v53_v15   ;;  %57 = vperm.xlu0 %338, %v51_v16   ;;  %v359_v24 = vld [vmem:[%s468_s0 + $0x10] ss:$8 sps:$4 sm:$0xff]  }
   0xb   :  { %298 = vmatpush3.bf16.msra.mxu0 %v345_v6  ;;  %331 = vmatpush3.bf16.msra.mxu1 %v345_v6 }
   0xc   :  { %299 = vmatprep.subr.bf16.mxu0 %v346_v7  ;;  %324 = vmatprep.subr.bf16.mxu1 %v346_v7 }
   0xd   :  { %72 = vperm.xlu1 %339, %v54_v19   ;;  %62 = vperm.xlu0 %338, %v52_v20  }
   0xf   :  { %300 = vmatpush3.bf16.msra.mxu0 %v347_v8  ;;  %332 = vmatpush3.bf16.msra.mxu1 %v347_v8 }
  0x10   :  { %301 = vmatprep.subr.bf16.mxu0 %v348_v9  ;;  %325 = vmatprep.subr.bf16.mxu1 %v348_v9 }
  0x13   :  { %302 = vmatpush3.bf16.msra.mxu0 %v349_v10  ;;  %333 = vmatpush3.bf16.msra.mxu1 %v349_v10 }
  0x14   :  { %303 = vmatprep.subr.bf16.mxu0 %v350_v11  ;;  %326 = vmatprep.subr.bf16.mxu1 %v350_v11 }
  0x17   :  { %304 = vmatpush3.bf16.msra.mxu0 %v351_v14  ;;  %334 = vmatpush3.bf16.msra.mxu1 %v351_v14 }
  0x18   :  { %305 = vmatprep.subr.bf16.mxu0 %v352_v17  ;;  %327 = vmatprep.subr.bf16.mxu1 %v352_v17 }
  0x1b   :  { %306 = vmatpush3.bf16.msra.mxu0 %v353_v18  ;;  %335 = vmatpush3.bf16.msra.mxu1 %v353_v18 }
  0x1c   :  { %307 = vmatprep.subr.bf16.mxu0 %v354_v21  ;;  %328 = vmatprep.subr.bf16.mxu1 %v354_v21 }
  0x1f   :  { %308 = vmatpush3.bf16.msra.mxu0 %v355_v22  ;;  %336 = vmatpush3.bf16.msra.mxu1 %v355_v22 }
  0x22   :  { %224 = vmatmul.mubr.bf16.vlgmr.msra.gmra.mrb[0].mxu0 %v356_v23  ;;  %232 = vmatmul.mubr.bf16.vlgmr.msra.gmra.mrb[0].mxu1 %v359_v24 }
  0x88   :  { %v68_v25 = vpop.permute.xlu1 %67  ;;  %v58_v26 = vpop.permute.xlu0 %57 }
  0x8c   :  { %v73_v41 = vpop.permute.xlu1 %72  ;;  %v63_v42 = vpop.permute.xlu0 %62 }
  0xf5   :  { %v309_v27 = vpop.f32.mrb[0].mxu0  ;;  %v315_v28 = vpop.f32.mrb[0].mxu1 }
  0xf6   :  { %v310_v29 = vpop.f32.mrb[1].mxu0  ;;  %v316_v30 = vpop.f32.mrb[1].mxu1 }
  0xf7   :  { %v311_v31 = vadd.f32 %v310_v29, %v309_v27  ;;  %v317_v32 = vadd.f32 %v316_v30, %v315_v28  ;;  %v312_v33 = vpop.f32.mrb[2].mxu0  ;;  %v318_v34 = vpop.f32.mrb[2].mxu1 }
  0xf8   :  { %v313_v35 = vpop.f32.mrb[3].mxu0  ;;  %v319_v36 = vpop.f32.mrb[3].mxu1 }
  0xf9   :  { %v226_v37 = vadd.f32 %v311_v31, %v58_v26  ;;  %v234_v38 = vadd.f32 %v317_v32, %v68_v25  ;;  %v314_v39 = vadd.f32 %v313_v35, %v312_v33  ;;  %v320_v40 = vadd.f32 %v319_v36, %v318_v34 }
  0xfb   :  { %v289_v43 = vpack.c.bf16 %v226_v37, %v226_v37  ;;  %v291_v44 = vpack.c.bf16 %v234_v38, %v234_v38  ;;  %v229_v45 = vadd.f32 %v314_v39, %v63_v42  ;;  %v237_v46 = vadd.f32 %v320_v40, %v73_v41 }
  0xfd   :  { %257 = vst.msk [vmem:[%s470_s3] sm:$0xf] %vm256_vm0, %v289_v43  ;;  %259 = vst.msk [vmem:[%s470_s3 + $0x8] sm:$0xf] %vm256_vm0, %v291_v44  ;;  %v290_v47 = vpack.c.bf16 %v229_v45, %v229_v45  ;;  %v292_v48 = vpack.c.bf16 %v237_v46, %v237_v46 }
  0xff   :  { %258 = vst.msk [vmem:[%s470_s3 + $0x4] sm:$0xf] %vm256_vm0, %v290_v47  ;;  %260 = vst.msk [vmem:[%s470_s3 + $0xc] sm:$0xf] %vm256_vm0, %v292_v48 }

</bundles_post_ra>
